<compile_context>
chip_gen: v6e
topology: v6e:2x2x1
jax: 0.10.0
libtpu: 0.0.40
codegen_flags: <defaults>
</compile_context>

<pallas_src>
import functools

import jax
import jax.numpy as jnp
from jax.experimental import pallas as pl
from jax.experimental.pallas import tpu as pltpu


def _round_up(x, m):
    return ((x + m - 1) // m) * m


def charcnn_kernel(x_ref, w_ref, b_ref, o_ref, *, kh, pad_h, h_out, dim):
    """Fused Conv2d(in=1, kernel=(KH, D)) + max-over-chars for one tile of examples.

    x_ref: (BN, max_char*dim)  raw char embeddings, flattened lane-dense, f32
    w_ref: (kh*dim, OC)        conv weight as an im2col matrix, bf16
    b_ref: (1, OC)             conv bias, f32
    o_ref: (BN, OC)            max-pooled conv features, f32
    """
    bn = x_ref.shape[0]

    # Load the whole tile lane-dense and cast to bf16 exactly once.
    x = x_ref[...].astype(jnp.bfloat16)                      # (BN, max_char*dim)

    # Zero halo on the char axis == pad_h*dim zero columns on the flat axis.
    if pad_h > 0:
        z = jnp.zeros((bn, pad_h * dim), jnp.bfloat16)
        xp = jnp.concatenate([z, x, z], axis=1)              # (BN, (max_char+2p)*dim)
    else:
        xp = x

    # im2col: output char-position h consumes the contiguous window
    # [h*dim, h*dim + kh*dim) of the flattened padded char axis (row-major over
    # (k, d), matching the weight layout).  Stack windows along sublanes.
    xi = jnp.concatenate(
        [xp[:, h * dim: h * dim + kh * dim] for h in range(h_out)], axis=0
    )                                                         # (h_out*BN, kh*dim)

    # Single MXU matmul with contraction K = kh*dim; f32 accumulation.
    conv = jnp.dot(xi, w_ref[...], preferred_element_type=jnp.float32)
    conv = conv.reshape(h_out, bn, conv.shape[-1])            # (h_out, BN, OC)

    # Bias after the max: max(conv + b) == max(conv) + b (per-channel constant).
    o_ref[...] = (jnp.max(conv, axis=0) + b_ref[...]).astype(o_ref.dtype)


def _pick_block_n(n, target):
    """Pick an example-tile size. Prefer divisors of n (no tail padding)."""
    target = max(8, target - target % 8)
    if n <= target:
        return n, n                       # single block, no padding
    if n % 8 == 0:
        for cand in range(target, 7, -8):
            # Accept a divisor as long as it is not pathologically small.
            if n % cand == 0 and cand * 4 >= target:
                return cand, n
    # Fall back to padding the tail (rare: n not nicely divisible).
    # TODO(synk): mask the tail tile in-kernel via scalar-prefetch length instead.
    return target, _round_up(n, target)


def char_cnn_forward(inputs, weight, bias, padding_h, *, target_block_n=1024):
    """inputs: (B, S, max_char, dim); weight: (OC, 1, KH, dim); bias: (OC,)."""
    batch, seq_len, max_char, dim = inputs.shape
    oc, in_ch, kh, kw = weight.shape
    assert in_ch == 1 and kw == dim, "forward() implies in_channels=1, kernel width=dim"

    h_out = max_char + 2 * padding_h - kh + 1
    assert h_out >= 1, "conv output height must be positive"

    n = batch * seq_len
    feat = max_char * dim

    # VMEM-aware cap on the tile size (conservative per-row working set).
    bytes_per_row = (feat * 4 * 2                       # x tile f32, double-buffered
                     + feat * 2                         # bf16 cast
                     + (feat + 2 * padding_h * dim) * 2 # padded flat row, bf16
                     + h_out * kh * dim * 2             # im2col operand, bf16
                     + h_out * oc * 4                   # matmul result, f32
                     + oc * 4 * 3)                      # max/out tiles
    vmem_budget = 20 * 1024 * 1024
    max_block = max(8, (vmem_budget // bytes_per_row) // 8 * 8)
    block_n, n_pad = _pick_block_n(n, min(target_block_n, max_block))

    # Lane-dense flat view of the char embeddings (free reshape, contiguous).
    x = inputs.reshape(n, feat)
    if n_pad != n:
        x = jnp.pad(x, ((0, n_pad - n), (0, 0)))

    # (OC, 1, KH, D) -> (KH*D, OC) im2col weight, bf16 (tiny, done once).
    w = jnp.transpose(weight[:, 0, :, :], (1, 2, 0)).reshape(kh * dim, oc)
    w = w.astype(jnp.bfloat16)
    b = bias.reshape(1, oc).astype(jnp.float32)

    grid = (n_pad // block_n,)
    out = pl.pallas_call(
        functools.partial(charcnn_kernel, kh=kh, pad_h=padding_h,
                          h_out=h_out, dim=dim),
        out_shape=jax.ShapeDtypeStruct((n_pad, oc), jnp.float32),
        grid=grid,
        in_specs=[
            pl.BlockSpec((block_n, feat), lambda i: (i, 0)),
            pl.BlockSpec((kh * dim, oc), lambda i: (0, 0)),
            pl.BlockSpec((1, oc), lambda i: (0, 0)),
        ],
        out_specs=pl.BlockSpec((block_n, oc), lambda i: (i, 0)),
        compiler_params=pltpu.CompilerParams(
            dimension_semantics=("parallel",),
            vmem_limit_bytes=32 * 1024 * 1024,
        ),
    )(x, w, b)

    if n_pad != n:
        out = out[:n]
    return out.reshape(batch, seq_len, oc)


def char_cnn_reference(inputs, weight, bias, padding_h):
    """Pure-JAX reference mirroring the PyTorch NCHW conv exactly (f32)."""
    batch, seq_len, max_char, dim = inputs.shape
    oc = weight.shape[0]
    x = inputs.reshape(-1, 1, max_char, dim).astype(jnp.float32)   # NCHW
    y = jax.lax.conv_general_dilated(
        x, weight.astype(jnp.float32),
        window_strides=(1, 1),
        padding=((padding_h, padding_h), (0, 0)),
        dimension_numbers=('NCHW', 'OIHW', 'NCHW'),
        precision=jax.lax.Precision.HIGHEST)
    y = y + bias.reshape(1, oc, 1, 1)
    y = jnp.max(y, axis=2)                                          # max over H
    return y.reshape(batch, seq_len, oc)


if __name__ == "__main__":
    # Small shapes consistent with the module's forward.
    batch, seq_len, max_char, dim = 2, 8, 16, 16
    out_channels, kh, padding_h = 32, 3, 1   # Conv2d(1, 32, kernel_size=(3, dim), padding=(1, 0))

    key = jax.random.PRNGKey(0)
    k_in, k_w, k_b = jax.random.split(key, 3)

    inputs = jax.random.normal(k_in, (batch, seq_len, max_char, dim), jnp.float32)

    # Deterministic init mimicking PyTorch's uniform(-1/sqrt(fan_in), 1/sqrt(fan_in)).
    fan_in = 1 * kh * dim
    bound = 1.0 / (fan_in ** 0.5)
    weight = jax.random.uniform(k_w, (out_channels, 1, kh, dim), jnp.float32,
                                minval=-bound, maxval=bound)
    bias = jax.random.uniform(k_b, (out_channels,), jnp.float32,
                              minval=-bound, maxval=bound)

    out = char_cnn_forward(inputs, weight, bias, padding_h)
    out = jax.block_until_ready(out)
    assert out.shape == (batch, seq_len, out_channels)

    # Kernel uses bf16 matmul operands (f32 accumulation); compare against the f32
    # reference evaluated on bf16-rounded inputs/weights so the check is tight.
    inputs_r = inputs.astype(jnp.bfloat16).astype(jnp.float32)
    weight_r = weight.astype(jnp.bfloat16).astype(jnp.float32)
    ref = char_cnn_reference(inputs_r, weight_r, bias, padding_h)
    err = jnp.max(jnp.abs(out - ref))
    assert jnp.allclose(out, ref, atol=1e-3, rtol=1e-3), f"max abs err {err}"

    # Loose sanity check against the true-f32 reference (bf16 rounding noise only).
    ref_f32 = char_cnn_reference(inputs, weight, bias, padding_h)
    assert jnp.allclose(out, ref_f32, atol=5e-2, rtol=5e-2)

    print("KERNEL_OK")
</pallas_src>

<mosaic_0001>
module attributes {stable_mosaic.version = 11 : i64} {
  func.func @charcnn_kernel(%arg0: i32, %arg1: memref<16x256xf32, #tpu.memory_space<vmem>>, %arg2: memref<48x32xbf16, #tpu.memory_space<vmem>>, %arg3: memref<1x32xf32, #tpu.memory_space<vmem>>, %arg4: memref<16x32xf32, #tpu.memory_space<vmem>>) attributes {dimension_semantics = [#tpu.dimension_semantics<parallel>], iteration_bounds = array<i64: 1>, scalar_prefetch = 0 : i64, scratch_operands = 0 : i64, tpu.core_type = #tpu.core_type<tc>, window_params = [{transform_indices = @transform_0, window_bounds = array<i64: 16, 256>}, {pipeline_mode = #tpu.pipeline_mode<synchronous>, transform_indices = @transform_1, window_bounds = array<i64: 48, 32>}, {pipeline_mode = #tpu.pipeline_mode<synchronous>, transform_indices = @transform_2, window_bounds = array<i64: 1, 32>}, {transform_indices = @transform_3, window_bounds = array<i64: 16, 32>}]} {
    %c0 = arith.constant 0 : index
    %c0_0 = arith.constant 0 : index
    %0 = vector.load %arg1[%c0, %c0_0] : memref<16x256xf32, #tpu.memory_space<vmem>>, vector<16x256xf32>
    %1 = arith.truncf %0 : vector<16x256xf32> to vector<16x256xbf16>
    %cst = arith.constant 0.000000e+00 : bf16
    %2 = vector.broadcast %cst : bf16 to vector<16x16xbf16>
    %3 = tpu.concatenate %2, %1, %2 in 1 : vector<16x16xbf16>, vector<16x256xbf16>, vector<16x16xbf16> -> vector<16x288xbf16>
    %4 = vector.extract_strided_slice %3 {offsets = [0, 0], sizes = [16, 48], strides = [1, 1]} : vector<16x288xbf16> to vector<16x48xbf16>
    %5 = vector.extract_strided_slice %3 {offsets = [0, 16], sizes = [16, 48], strides = [1, 1]} : vector<16x288xbf16> to vector<16x48xbf16>
    %6 = vector.extract_strided_slice %3 {offsets = [0, 32], sizes = [16, 48], strides = [1, 1]} : vector<16x288xbf16> to vector<16x48xbf16>
    %7 = vector.extract_strided_slice %3 {offsets = [0, 48], sizes = [16, 48], strides = [1, 1]} : vector<16x288xbf16> to vector<16x48xbf16>
    %8 = vector.extract_strided_slice %3 {offsets = [0, 64], sizes = [16, 48], strides = [1, 1]} : vector<16x288xbf16> to vector<16x48xbf16>
    %9 = vector.extract_strided_slice %3 {offsets = [0, 80], sizes = [16, 48], strides = [1, 1]} : vector<16x288xbf16> to vector<16x48xbf16>
    %10 = vector.extract_strided_slice %3 {offsets = [0, 96], sizes = [16, 48], strides = [1, 1]} : vector<16x288xbf16> to vector<16x48xbf16>
    %11 = vector.extract_strided_slice %3 {offsets = [0, 112], sizes = [16, 48], strides = [1, 1]} : vector<16x288xbf16> to vector<16x48xbf16>
    %12 = vector.extract_strided_slice %3 {offsets = [0, 128], sizes = [16, 48], strides = [1, 1]} : vector<16x288xbf16> to vector<16x48xbf16>
    %13 = vector.extract_strided_slice %3 {offsets = [0, 144], sizes = [16, 48], strides = [1, 1]} : vector<16x288xbf16> to vector<16x48xbf16>
    %14 = vector.extract_strided_slice %3 {offsets = [0, 160], sizes = [16, 48], strides = [1, 1]} : vector<16x288xbf16> to vector<16x48xbf16>
    %15 = vector.extract_strided_slice %3 {offsets = [0, 176], sizes = [16, 48], strides = [1, 1]} : vector<16x288xbf16> to vector<16x48xbf16>
    %16 = vector.extract_strided_slice %3 {offsets = [0, 192], sizes = [16, 48], strides = [1, 1]} : vector<16x288xbf16> to vector<16x48xbf16>
    %17 = vector.extract_strided_slice %3 {offsets = [0, 208], sizes = [16, 48], strides = [1, 1]} : vector<16x288xbf16> to vector<16x48xbf16>
    %18 = vector.extract_strided_slice %3 {offsets = [0, 224], sizes = [16, 48], strides = [1, 1]} : vector<16x288xbf16> to vector<16x48xbf16>
    %19 = vector.extract_strided_slice %3 {offsets = [0, 240], sizes = [16, 48], strides = [1, 1]} : vector<16x288xbf16> to vector<16x48xbf16>
    %20 = tpu.concatenate %4, %5, %6, %7, %8, %9, %10, %11, %12, %13, %14, %15, %16, %17, %18, %19 in 0 : vector<16x48xbf16>, vector<16x48xbf16>, vector<16x48xbf16>, vector<16x48xbf16>, vector<16x48xbf16>, vector<16x48xbf16>, vector<16x48xbf16>, vector<16x48xbf16>, vector<16x48xbf16>, vector<16x48xbf16>, vector<16x48xbf16>, vector<16x48xbf16>, vector<16x48xbf16>, vector<16x48xbf16>, vector<16x48xbf16>, vector<16x48xbf16> -> vector<256x48xbf16>
    %c0_1 = arith.constant 0 : index
    %c0_2 = arith.constant 0 : index
    %21 = vector.load %arg2[%c0_1, %c0_2] : memref<48x32xbf16, #tpu.memory_space<vmem>>, vector<48x32xbf16>
    %cst_3 = arith.constant dense<0.000000e+00> : vector<256x32xf32>
    %22 = tpu.matmul %20, %21, %cst_3 {dimension_numbers = #tpu.dot_dimension_numbers<[1], [0], [0], [1], [0, 0, 1, 1], [], []>} : vector<256x48xbf16>, vector<48x32xbf16>, vector<256x32xf32> -> vector<256x32xf32>
    %23 = vector.shape_cast %22 : vector<256x32xf32> to vector<16x16x32xf32>
    %cst_4 = arith.constant dense<0xFF800000> : vector<16x32xf32>
    %24 = vector.multi_reduction <maximumf>, %23, %cst_4 [0] : vector<16x16x32xf32> to vector<16x32xf32>
    %c0_5 = arith.constant 0 : index
    %c0_6 = arith.constant 0 : index
    %25 = vector.load %arg3[%c0_5, %c0_6] : memref<1x32xf32, #tpu.memory_space<vmem>>, vector<1x32xf32>
    %26 = vector.broadcast %25 : vector<1x32xf32> to vector<16x32xf32>
    %27 = arith.addf %24, %26 : vector<16x32xf32>
    %c0_7 = arith.constant 0 : index
    %c0_8 = arith.constant 0 : index
    %28 = vector.load %arg4[%c0_7, %c0_8] : memref<16x32xf32, #tpu.memory_space<vmem>>, vector<16x32xf32>
    tpu.vector_store %arg4[%c0_7, %c0_8], %27 {strides = array<i32>} : memref<16x32xf32, #tpu.memory_space<vmem>>, vector<16x32xf32>,
    return
  }
  func.func @transform_0(%arg0: i32) -> (i32, i32) {
    %c0_i32 = arith.constant 0 : i32
    %c0_i32_0 = arith.constant 0 : i32
    return %arg0, %c0_i32 : i32, i32
  }
  func.func @transform_1(%arg0: i32) -> (i32, i32) {
    %c0_i32 = arith.constant 0 : i32
    %c0_i32_0 = arith.constant 0 : i32
    %c0_i32_1 = arith.constant 0 : i32
    return %c0_i32, %c0_i32_0 : i32, i32
  }
  func.func @transform_2(%arg0: i32) -> (i32, i32) {
    %c0_i32 = arith.constant 0 : i32
    %c0_i32_0 = arith.constant 0 : i32
    %c0_i32_1 = arith.constant 0 : i32
    return %c0_i32, %c0_i32_0 : i32, i32
  }
  func.func @transform_3(%arg0: i32) -> (i32, i32) {
    %c0_i32 = arith.constant 0 : i32
    %c0_i32_0 = arith.constant 0 : i32
    return %arg0, %c0_i32 : i32, i32
  }
}

</mosaic_0001>

<bundles_post_ra>
// kernel: tpu_custom_call.1
= control target key start
LH: loop header
LB: loop body
LE: loop exit
PB: predicated region body
PF: predicated region fallthrough
CT: control target
= control target key end

     0   :  { %s516_s20 = smov 16   ;;  %s635_s0 = inlined_call_operand.vmem [shape: f32[16,256], index: 0, kind: input, shape index: {}]   ;;  %s636_s1 = inlined_call_operand.vmem [shape: bf16[48,32], index: 1, kind: input, shape index: {}]   ;;  %s637_s2 = inlined_call_operand.vmem [shape: f32[1,32], index: 2, kind: input, shape index: {}]   ;;  %s638_s3 = inlined_call_operand.hbm [shape: f32[16,32], index: 3, kind: output, shape index: {}]  }
   0x1   :  { %v16_v0 = vld [vmem:[%s635_s0] sm:$0xff]  ;;  %v18_v1 = vld [vmem:[%s635_s0 + $0x10] sm:$0xff]  ;;  %v17_v2 = vld [vmem:[%s635_s0 + $0x8] sm:$0xff] }
   0x2   :  { %v20_v3 = vpack.c.bf16 %v18_v1, %v16_v0  ;;  %v19_v4 = vld [vmem:[%s635_s0 + $0x18] sm:$0xff] }
   0x3   :  { %v21_v5 = vpack.c.bf16 %v19_v4, %v17_v2 }
   0x4   :  { %24 = vrot.lane.b32.xlu0 %v20_v3, %s516_s20 }
   0x5   :  { %8 = vsyncpa [#allocation3], 0  ;;  %v491_v6 = vld [vmem:[%s636_s1 + $0x10] sm:$0xff]   ;;  %v492_v7 = vld [vmem:[%s636_s1 + $0x8] sm:$0xff]   ;;  %vm28_vm0 = vcmask 130048   ;;  %vm99_vm1 = vcmask 392192  }
   0x6   :  { %437 = vmatprep.subr.bf16.mxu0 %v491_v6  ;;  %475 = vmatprep.subr.bf16.mxu1 %v491_v6  ;;  %v493_v8 = vld [vmem:[%s636_s1] sm:$0xff]   ;;  %s517_s26 = smov 80   ;;  %s518_s27 = smov 112   ;;  %vm51_vm2 = vcmask 261120  }
   0x7   :  { %438 = vmatpush3.bf16.msra.mxu0 %v491_v6  ;;  %478 = vmatpush3.bf16.msra.mxu1 %v491_v6  ;;  %s519_s1 = smov 64   ;;  %s520_s28 = smov 96  }
   0x8   :  { %26 = vrot.lane.b32.xlu0 %v21_v5, %s516_s20  ;;  %439 = vmatprep.subr.bf16.mxu0 %v492_v7  ;;  %s521_s29 = smov 48   ;;  %s522_s30 = smov 32  }
   0x9   :  { %476 = vmatprep.subr.bf16.mxu1 %v492_v7  ;;  %s523_s6 = smov [#allocation2]  }
   0xa   :  { %s387_s7 = sshll.u32 %s523_s6, 4  ;;  %s388_s7 = int_to_ptr.vmem [resolvable:$true] %s387_s7 }
   0xb   :  { %440 = vmatpush3.bf16.msra.mxu0 %v492_v7  ;;  %479 = vmatpush3.bf16.msra.mxu1 %v492_v7  ;;  %p499_p1 = scmp.lt.s32.totalorder %s388_s7, %s388_s7 }
   0xc   :  { %441 = vmatprep.subr.bf16.mxu0 %v493_v8  ;;  %477 = vmatprep.subr.bf16.mxu1 %v493_v8 }
   0xf   :  { %442 = vmatpush3.bf16.msra.mxu0 %v493_v8  ;;  %480 = vmatpush3.bf16.msra.mxu1 %v493_v8 }
  0x76   :  { %v25_v9 = vpop.permute.xlu0 %24 }
  0x77   :  { %v33_v10 = vsel %vm28_vm0, 0, %v25_v9 }
  0x78   :  { %41 = vrot.lane.b32.xlu0 %v33_v10, %s517_s26  ;;  %37 = vrot.lane.b32.xlu1 %v33_v10, %s518_s27 }
  0x79   :  { %443 = vmatprep.mubr.msk.bf16.mxu0 %vm99_vm1, %v33_v10 }
  0x7a   :  { %v27_v11 = vpop.permute.xlu0 %26 }
  0x7b   :  { %v29_v12 = vsel %vm28_vm0, %v25_v9, %v27_v11  ;;  %v35_v13 = vsel %vm28_vm0, %v27_v11, 0 }
  0x7c   :  { %43 = vrot.lane.b32.xlu0 %v33_v10, %s519_s1  ;;  %39 = vrot.lane.b32.xlu1 %v33_v10, %s520_s28 }
  0x7d   :  { %459 = vmatprep.mubr.msk.bf16.mxu1 %vm99_vm1, %v29_v12 }
  0x80   :  { %45 = vrot.lane.b32.xlu0 %v33_v10, %s521_s29  ;;  %58 = vrot.lane.b32.xlu1 %v29_v12, %s518_s27 }
  0x84   :  { %47 = vrot.lane.b32.xlu0 %v33_v10, %s522_s30  ;;  %60 = vrot.lane.b32.xlu1 %v29_v12, %s520_s28 }
  0x88   :  { %53 = vrot.lane.b32.xlu0 %v33_v10, %s516_s20  ;;  %62 = vrot.lane.b32.xlu1 %v29_v12, %s517_s26 }
  0x8c   :  { %64 = vrot.lane.b32.xlu0 %v29_v12, %s519_s1  ;;  %49 = vrot.lane.b32.xlu1 %v29_v12, %s522_s30 }
  0x90   :  { %69 = vrot.lane.b32.xlu0 %v35_v13, %s522_s30  ;;  %55 = vrot.lane.b32.xlu1 %v29_v12, %s516_s20 }
  0x94   :  { %66 = vrot.lane.b32.xlu1 %v29_v12, %s521_s29 }
  0x98   :  { %72 = vrot.lane.b32.xlu1 %v35_v13, %s516_s20 }
  0xea   :  { %v38_v14 = vpop.permute.xlu1 %37  ;;  %v42_v15 = vpop.permute.xlu0 %41 }
  0xeb   :  { %444 = vmatmul.mubr.msk.bf16.vlgmr.msra.gmra.mxu0 %vm99_vm1, %v38_v14 }
  0xee   :  { %v40_v16 = vpop.permute.xlu1 %39  ;;  %v44_v17 = vpop.permute.xlu0 %43 }
  0xef   :  { %447 = vmatprep.mubr.msk.bf16.mxu0 %vm99_vm1, %v40_v16 }
  0xf2   :  { %v59_v18 = vpop.permute.xlu1 %58  ;;  %v46_v19 = vpop.permute.xlu0 %45 }
  0xf3   :  { %448 = vmatmul.mubr.msk.bf16.gmra.mxu0 %vm99_vm1, %v42_v15  ;;  %460 = vmatmul.mubr.msk.bf16.vlgmr.msra.gmra.mxu1 %vm99_vm1, %v59_v18 }
  0xf4   :  { %451 = vmatprep.mubr.msk.bf16.mxu0 %vm99_vm1, %v44_v17 }
  0xf6   :  { %v61_v20 = vpop.permute.xlu1 %60  ;;  %v48_v21 = vpop.permute.xlu0 %47 }
  0xf7   :  { %463 = vmatprep.mubr.msk.bf16.mxu1 %vm99_vm1, %v61_v20 }
  0xfa   :  { %v63_v22 = vpop.permute.xlu1 %62  ;;  %v54_v23 = vpop.permute.xlu0 %53 }
  0xfb   :  { %452 = vmatmul.mubr.msk.bf16.gmra.mxu0 %vm99_vm1, %v46_v19  ;;  %464 = vmatmul.mubr.msk.bf16.gmra.mxu1 %vm99_vm1, %v63_v22 }
  0xfe   :  { %v50_v24 = vpop.permute.xlu1 %49  ;;  %v65_v25 = vpop.permute.xlu0 %64 }
  0xff   :  { %v52_v26 = vsel %vm51_vm2, %v48_v21, %v50_v24  ;;  %467 = vmatprep.mubr.msk.bf16.mxu1 %vm99_vm1, %v65_v25 }
 0x100   :  { %455 = vmatprep.mubr.msk.bf16.mxu0 %vm99_vm1, %v52_v26 }
 0x102   :  { %v56_v27 = vpop.permute.xlu1 %55  ;;  %v70_v29 = vpop.permute.xlu0 %69 }
 0x103   :  { %v57_v28 = vsel %vm28_vm0, %v54_v23, %v56_v27  ;;  %v71_v31 = vsel %vm51_vm2, %v50_v24, %v70_v29 }
 0x104   :  { %456 = vmatmul.mubr.msk.bf16.gmra.mxu0 %vm99_vm1, %v57_v28 }
 0x106   :  { %v67_v30 = vpop.permute.xlu1 %66 }
 0x107   :  { %468 = vmatmul.mubr.msk.bf16.gmra.mxu1 %vm99_vm1, %v67_v30 }
 0x108   :  { %471 = vmatprep.mubr.msk.bf16.mxu1 %vm99_vm1, %v71_v31 }
 0x10a   :  { %v73_v32 = vpop.permute.xlu1 %72 }
 0x10b   :  { %v74_v33 = vsel %vm28_vm0, %v56_v27, %v73_v32 }
 0x10f   :  { %472 = vmatmul.mubr.msk.bf16.gmra.mxu1 %vm99_vm1, %v74_v33 }
 0x1ab   :  { %v445_v34 = vpop.f32.mrf.mxu0 }
 0x1ac   :  { %v310_v52 = vsel %vm51_vm2, %v445_v34, -inf }
 0x1ad   :  { %v181_v35 = vpop.f32.mrf.mxu0 }
 0x1ae   :  { %v309_v58 = vsel %vm51_vm2, %v181_v35, -inf }
 0x1af   :  { %v446_v36 = vpop.f32.mrf.mxu0 }
 0x1b0   :  { %v341_v0 = vsel %vm51_vm2, %v446_v36, -inf }
 0x1b1   :  { %v184_v37 = vpop.f32.mrf.mxu0 }
 0x1b2   :  { %v340_v9 = vsel %vm51_vm2, %v184_v37, -inf }
 0x1b3   :  { %v449_v38 = vpop.f32.mrf.mxu0  ;;  %v461_v39 = vpop.f32.mrf.mxu1 }
 0x1b4   :  { %v313_v50 = vsel %vm51_vm2, %v449_v38, -inf  ;;  %v325_v13 = vsel %vm51_vm2, %v461_v39, -inf }
 0x1b5   :  { %v197_v40 = vpop.f32.mrf.mxu0  ;;  %v245_v41 = vpop.f32.mrf.mxu1  ;;  %v314_v57 = vmax.f32 %v310_v52, %v313_v50 }
 0x1b6   :  { %v311_v53 = vsel %vm51_vm2, %v197_v40, -inf  ;;  %v323_v18 = vsel %vm51_vm2, %v245_v41, -inf }
 0x1b7   :  { %v450_v42 = vpop.f32.mrf.mxu0  ;;  %v462_v43 = vpop.f32.mrf.mxu1  ;;  %v312_v61 = vmax.f32 %v309_v58, %v311_v53 }
 0x1b8   :  { %v344_v59 = vsel %vm51_vm2, %v450_v42, -inf  ;;  %v356_v28 = vsel %vm51_vm2, %v462_v43, -inf }
 0x1b9   :  { %v200_v44 = vpop.f32.mrf.mxu0  ;;  %v248_v45 = vpop.f32.mrf.mxu1  ;;  %v345_v5 = vmax.f32 %v341_v0, %v344_v59 }
 0x1ba   :  { %v342_v1 = vsel %vm51_vm2, %v200_v44, -inf  ;;  %v354_v32 = vsel %vm51_vm2, %v248_v45, -inf }
 0x1bb   :  { %v453_v46 = vpop.f32.mrf.mxu0  ;;  %v465_v47 = vpop.f32.mrf.mxu1  ;;  %v343_v14 = vmax.f32 %v340_v9, %v342_v1 }
 0x1bc   :  { %v317_v54 = vsel %vm51_vm2, %v453_v46, -inf  ;;  %v329_v29 = vsel %vm51_vm2, %v465_v47, -inf }
 0x1bd   :  { %v213_v48 = vpop.f32.mrf.mxu0  ;;  %v261_v49 = vpop.f32.mrf.mxu1  ;;  %v318_v62 = vmax.f32 %v314_v57, %v317_v54 }
 0x1be   :  { %v315_v60 = vsel %vm51_vm2, %v213_v48, -inf  ;;  %v327_v30 = vsel %vm51_vm2, %v261_v49, -inf }
 0x1bf   :  { %v454_v51 = vpop.f32.mrf.mxu0  ;;  %v466_v55 = vpop.f32.mrf.mxu1  ;;  %v316_v6 = vmax.f32 %v312_v61, %v315_v60 }
 0x1c0   :  { %v348_v2 = vsel %vm51_vm2, %v454_v51, -inf  ;;  %v360_v38 = vsel %vm51_vm2, %v466_v55, -inf  ;;  %v417_v55 = vld [vmem:[%s637_s2] ss:$0 sm:$0xff]  ;;  %s494_s2 = scalar_lea.vmem %s388_s7, 256 }
 0x1c1   :  { %v216_v56 = vpop.f32.mrf.mxu0  ;;  %v264_v3 = vpop.f32.mrf.mxu1  ;;  %v349_v15 = vmax.f32 %v345_v5, %v348_v2  ;;  %p495_p0 = scmp.ne.s32.totalorder %s388_s7, %s494_s2  ;;  %p500_p2 = scmp.lt.s32.totalorder %s494_s2, %s494_s2 }
 0x1c2   :  { %v346_v10 = vsel %vm51_vm2, %v216_v56, -inf  ;;  %v358_v40 = vsel %vm51_vm2, %v264_v3, -inf }
 0x1c3   :  { %v347_v22 = vmax.f32 %v343_v14, %v346_v10  ;;  %p501_p3 = por %p500_p2, %p499_p1 }
 0x1c4   :  { %v457_v63 = vpop.f32.mrf.mxu0 }
 0x1c5   :  { %v321_v4 = vsel %vm51_vm2, %v457_v63, -inf  ;;  %p502_p4 = pnand %p501_p3, %p495_p0 }
 0x1c6   :  { %v322_v7 = vmax.f32 %v318_v62, %v321_v4  ;;  %v229_v8 = vpop.f32.mrf.mxu0 }
 0x1c7   :  { %v319_v11 = vsel %vm51_vm2, %v229_v8, -inf  ;;  %v469_v12 = vpop.f32.mrf.mxu1 }
 0x1c8   :  { %v320_v16 = vmax.f32 %v316_v6, %v319_v11  ;;  %v458_v17 = vpop.f32.mrf.mxu0  ;;  %v326_v19 = vmax.f32 %v322_v7, %v325_v13  ;;  %v333_v41 = vsel %vm51_vm2, %v469_v12, -inf }
 0x1c9   :  { %v352_v20 = vsel %vm51_vm2, %v458_v17, -inf  ;;  %v277_v21 = vpop.f32.mrf.mxu1 }
 0x1ca   :  { %v324_v23 = vmax.f32 %v320_v16, %v323_v18  ;;  %v353_v24 = vmax.f32 %v349_v15, %v352_v20  ;;  %v232_v25 = vpop.f32.mrf.mxu0  ;;  %v330_v33 = vmax.f32 %v326_v19, %v329_v29  ;;  %v331_v42 = vsel %vm51_vm2, %v277_v21, -inf }
 0x1cb   :  { %v350_v26 = vsel %vm51_vm2, %v232_v25, -inf  ;;  %v470_v27 = vpop.f32.mrf.mxu1 }
 0x1cc   :  { %v351_v31 = vmax.f32 %v347_v22, %v350_v26  ;;  %v357_v34 = vmax.f32 %v353_v24, %v356_v28  ;;  %v328_v35 = vmax.f32 %v324_v23, %v327_v30  ;;  %v334_v44 = vmax.f32 %v330_v33, %v333_v41 }
 0x1cd   :  { %v280_v36 = vpop.f32.mrf.mxu1  ;;  %v364_v53 = vsel %vm51_vm2, %v470_v27, -inf }
 0x1ce   :  { %v355_v37 = vmax.f32 %v351_v31, %v354_v32  ;;  %v332_v46 = vmax.f32 %v328_v35, %v331_v42  ;;  %v361_v47 = vmax.f32 %v357_v34, %v360_v38  ;;  %v362_v54 = vsel %vm51_vm2, %v280_v36, -inf }
 0x1cf   :  { %v473_v39 = vpop.f32.mrf.mxu1 }
 0x1d0   :  { %v337_v43 = vsel %vm51_vm2, %v473_v39, -inf  ;;  %v359_v45 = vmax.f32 %v355_v37, %v358_v40  ;;  %v365_v57 = vmax.f32 %v361_v47, %v364_v53 }
 0x1d1   :  { %v293_v48 = vpop.f32.mrf.mxu1  ;;  %v338_v50 = vmax.f32 %v334_v44, %v337_v43 }
 0x1d2   :  { %v335_v49 = vsel %vm51_vm2, %v293_v48, -inf  ;;  %v363_v58 = vmax.f32 %v359_v45, %v362_v54 }
 0x1d3   :  { %v336_v51 = vmax.f32 %v332_v46, %v335_v49  ;;  %v474_v52 = vpop.f32.mrf.mxu1 }
 0x1d4   :  { %v368_v56 = vsel %vm51_vm2, %v474_v52, -inf }
 0x1d5   :  { %v339_v59 = vmax.f32 %v336_v51, %v338_v50  ;;  %v296_v60 = vpop.f32.mrf.mxu1  ;;  %v369_v63 = vmax.f32 %v365_v57, %v368_v56 }
 0x1d6   :  { %v366_v61 = vsel %vm51_vm2, %v296_v60, -inf }
 0x1d7   :  { %v378_v62 = vadd.f32 %v417_v55, %v339_v59  ;;  %v367_v0 = vmax.f32 %v363_v58, %v366_v61 }
 0x1d9   :  { %380 = vst.msk [vmem:[#allocation2] sm:$0xff] %vm51_vm2, %v378_v62  ;;  %v370_v1 = vmax.f32 %v367_v0, %v369_v63 }
 0x1db   :  { %v379_v2 = vadd.f32 %v417_v55, %v370_v1 }
 0x1dd   :  { %381 = vst.msk [vmem:[#allocation2 + $0x8] sm:$0xff] %vm51_vm2, %v379_v2 }
 0x1de   :  { %505 = shalt.err (!%p502_p4)
}
 0x1df   :  { %s524_s8 = smov 128   ;;  %s525_s9 = smov 8  }
 0x1e0   :  { %393 = dma.vmem_to_hbm [thread:$0]  %s388_s7, 256, %s638_s3, [#allocation3], %s524_s8, %s524_s8, %s525_s9  }
 0x1e1   :  { %514 = dma.done.wait [#allocation3], 256  }
 0x1e2   :  { %515 = vsyncadd [#allocation3], 4294967040 }
 0x1e3   :  { %397 = vsyncpa [#allocation3], 1 }

</bundles_post_ra>
